<compile_context>
chip_gen: v6e
topology: v6e:2x2x1
jax: 0.10.0
libtpu: 0.0.40
codegen_flags: <defaults>
</compile_context>

<pallas_src>
import functools

import jax
import jax.numpy as jnp
from jax.experimental import pallas as pl
from jax.experimental.pallas import tpu as pltpu


def _softplus(x):
    # numerically stable softplus = max(x,0) + log1p(exp(-|x|))
    return jnp.maximum(x, 0.0) + jnp.log1p(jnp.exp(-jnp.abs(x)))


def _l2_normalize(v, eps2):
    # x / max(||x||, eps) == x * rsqrt(max(||x||^2, eps^2)); rsqrt -> EUP slot.
    inv = jax.lax.rsqrt(jnp.maximum(jnp.sum(v * v, axis=1, keepdims=True), eps2))
    return v * inv


def _aml_kernel(label_ref, x_ref, wl_ref, w_ref, cw_ref,      # inputs
                fea_ref, loss_ref,                            # outputs
                xn_c, wnl_c, sp_c, m_c, s_c, rmax_c,          # scratch
                *, gamma, lamda, block_c, mxu_dtype):
    j = pl.program_id(0)
    eps2 = jnp.float32(1e-24)          # (1e-12)^2, matches F.normalize eps

    # Normalize this step's class-weight tile.
    wn = _l2_normalize(w_ref[...], eps2)                      # (tc, E) f32

    @pl.when(j == 0)
    def _init():
        xn0 = _l2_normalize(x_ref[...], eps2)                 # (B, E)
        wnl0 = _l2_normalize(wl_ref[...], eps2)               # (B, E) = wn[label]
        xn_c[...] = xn0
        wnl_c[...] = wnl0
        # sp_b = <xn_b, wn_{label_b}> : target-class cosine similarity.
        sp_c[...] = jnp.sum(xn0 * wnl0, axis=1, keepdims=True)
        m_c[...] = jnp.full(m_c.shape, -jnp.inf, dtype=jnp.float32)
        s_c[...] = jnp.zeros(s_c.shape, dtype=jnp.float32)
        rmax_c[...] = jnp.full(rmax_c.shape, -jnp.inf, dtype=jnp.float32)

    xn = xn_c[...]
    wnl = wnl_c[...]

    dn = (((1,), (1,)), ((), ()))      # contract last dims of both -> no .T
    wn_m = wn.astype(mxu_dtype)

    # Cosine logits for this class tile: (B, tc)
    fea = jax.lax.dot_general(xn.astype(mxu_dtype), wn_m, dn,
                              preferred_element_type=jnp.float32)
    fea_ref[...] = fea

    B, tc = fea.shape
    labels = label_ref[...]                                   # (B, 1) i32
    col = jax.lax.broadcasted_iota(jnp.int32, (B, tc), 1) + j * block_c
    one_hot = col == labels                                   # (B, tc)

    # logit_j = gamma*sn_j + gamma*beta*m_j  (sp factored out; cw pre-scaled).
    logit = gamma * fea + cw_ref[...]
    logit = jnp.where(one_hot, jnp.float32(-1e30), logit)

    # Online logsumexp across class tiles.
    m_prev = m_c[...]
    m_new = jnp.maximum(m_prev, jnp.max(logit, axis=1, keepdims=True))
    s_c[...] = (s_c[...] * jnp.exp(m_prev - m_new)
                + jnp.sum(jnp.exp(logit - m_new), axis=1, keepdims=True))
    m_c[...] = m_new

    # Weight-similarity regularizer (reassociated): row b of the reference's
    # clip(wn @ wn.T)[label] is clip(<wn_label_b, wn_j>); the zeroed-diagonal
    # entry is exactly the label column, masked to 0.0 before the row max.
    reg = jax.lax.dot_general(wnl.astype(mxu_dtype), wn_m, dn,
                              preferred_element_type=jnp.float32)
    reg = jnp.clip(reg, -1.0, 1.0)
    reg = jnp.where(one_hot, 0.0, reg)
    rmax_c[...] = jnp.maximum(rmax_c[...],
                              jnp.max(reg, axis=1, keepdims=True))

    @pl.when(j == pl.num_programs(0) - 1)
    def _finalize():
        lse = m_c[...] + jnp.log(s_c[...]) - gamma * sp_c[...]   # (B, 1)
        loss_vec = _softplus(lse)
        loss_w = _softplus(jnp.mean(rmax_c[...]) + 0.5)
        loss_ref[0, 0] = jnp.mean(loss_vec) + lamda * loss_w


def adaptive_margin_loss(x, weight, class_weight, labels,
                         gamma=9.6, beta=0.83, lamda=10.0,
                         block_c=None, mxu_dtype=jnp.float32):
    B, E = x.shape
    C, _ = weight.shape

    # Class-tile size: 128-lane tiles when C allows it, else the full extent.
    # TODO(synk): pad C to a multiple of 128 for arbitrary production C.
    if block_c is None:
        block_c = 128 if (C > 128 and C % 128 == 0) else C
    assert C % block_c == 0
    num_ct = C // block_c

    x = x.astype(jnp.float32)
    weight = weight.astype(jnp.float32)
    labels_i = labels.reshape(B).astype(jnp.int32)
    labels2 = labels_i.reshape(B, 1)
    # Fold gamma*beta into the per-class margins once -> (1, C) constant.
    cw_scaled = (gamma * beta * class_weight).reshape(1, C).astype(jnp.float32)
    # Gather the label rows of the class-weight matrix once (B, E); replaces
    # the in-kernel (C, C) weight self-similarity matmul.
    w_label = jnp.take(weight, labels_i, axis=0)

    kernel = functools.partial(_aml_kernel, gamma=float(gamma),
                               lamda=float(lamda), block_c=block_c,
                               mxu_dtype=mxu_dtype)

    fea, loss = pl.pallas_call(
        kernel,
        out_shape=(jax.ShapeDtypeStruct((B, C), jnp.float32),
                   jax.ShapeDtypeStruct((1, 1), jnp.float32)),
        grid_spec=pltpu.PrefetchScalarGridSpec(
            num_scalar_prefetch=0,
            grid=(num_ct,),
            in_specs=[
                pl.BlockSpec((B, 1), lambda j: (0, 0)),          # labels
                pl.BlockSpec((B, E), lambda j: (0, 0)),          # x
                pl.BlockSpec((B, E), lambda j: (0, 0)),          # weight[labels]
                pl.BlockSpec((block_c, E), lambda j: (j, 0)),    # weight tile
                pl.BlockSpec((1, block_c), lambda j: (0, j)),    # scaled margins
            ],
            out_specs=(
                pl.BlockSpec((B, block_c), lambda j: (0, j)),    # fea
                pl.BlockSpec((1, 1), lambda j: (0, 0),
                             memory_space=pltpu.MemorySpace.SMEM),  # loss
            ),
            scratch_shapes=[
                pltpu.VMEM((B, E), jnp.float32),   # normalized x
                pltpu.VMEM((B, E), jnp.float32),   # normalized weight[labels]
                pltpu.VMEM((B, 1), jnp.float32),   # sp
                pltpu.VMEM((B, 1), jnp.float32),   # running max (lse)
                pltpu.VMEM((B, 1), jnp.float32),   # running sum (lse)
                pltpu.VMEM((B, 1), jnp.float32),   # running row-max (regularizer)
            ]),
        compiler_params=pltpu.CompilerParams(
            dimension_semantics=("arbitrary",)),
    )(labels2, x, w_label, weight, cw_scaled)
    return fea, loss[0, 0]


def _reference(x, weight, class_weight, labels, gamma=9.6, beta=0.83, lamda=10.0):
    # Plain-JAX reference mirroring the PyTorch module.
    eps = 1e-12
    xn = x / jnp.maximum(jnp.linalg.norm(x, axis=1, keepdims=True), eps)
    wn = weight / jnp.maximum(jnp.linalg.norm(weight, axis=1, keepdims=True), eps)
    fea = xn @ wn.T
    B, C = fea.shape
    one_hot = jax.nn.one_hot(labels, C, dtype=bool)
    sp = jnp.sum(jnp.where(one_hot, fea, 0.0), axis=1, keepdims=True)
    logit = gamma * (fea - sp + beta * class_weight[None, :])
    logit = jnp.where(one_hot, -jnp.inf, logit)
    lse = jax.scipy.special.logsumexp(logit, axis=1)
    loss_vec = jax.nn.softplus(lse)
    score = jnp.clip(wn @ wn.T, -1.0, 1.0)
    score = score - jnp.diag(jnp.diag(score))
    row_max = jnp.max(score[labels], axis=1)
    loss_w = jax.nn.softplus(jnp.mean(row_max) + 0.5)
    return fea, jnp.mean(loss_vec + lamda * loss_w)


def _make_inputs(key, B, E, C):
    k_x, k_w, k_l = jax.random.split(key, 3)
    x = jax.random.normal(k_x, (B, E), dtype=jnp.float32)
    bound = (6.0 / (C + E)) ** 0.5     # xavier_uniform_ for (class_num, emdsize)
    weight = jax.random.uniform(k_w, (C, E), dtype=jnp.float32,
                                minval=-bound, maxval=bound)
    class_weight = jnp.linspace(0.05, 0.5, C, dtype=jnp.float32)
    labels = jax.random.randint(k_l, (B,), 0, C, dtype=jnp.int32)
    return x, weight, class_weight, labels


if __name__ == "__main__":
    key = jax.random.PRNGKey(0)
    k1, k2 = jax.random.split(key)

    # 1) Module-like small shapes (batch=8, emdsize=32, class_num=16), f32 MXU.
    x, w, cw, lab = _make_inputs(k1, B=8, E=32, C=16)
    fea, loss = adaptive_margin_loss(x, w, cw, lab)
    jax.block_until_ready((fea, loss))
    fea_r, loss_r = _reference(x, w, cw, lab)
    assert jnp.allclose(fea, fea_r, rtol=2e-3, atol=2e-3)
    assert jnp.allclose(loss, loss_r, rtol=5e-3, atol=5e-2)

    # 2) Larger shapes exercising the class-tiled grid (C=256 -> grid=(2,)), f32.
    x2, w2, cw2, lab2 = _make_inputs(k2, B=8, E=128, C=256)
    fea2, loss2 = adaptive_margin_loss(x2, w2, cw2, lab2)
    jax.block_until_ready((fea2, loss2))
    fea2_r, loss2_r = _reference(x2, w2, cw2, lab2)
    assert jnp.allclose(fea2, fea2_r, rtol=2e-3, atol=2e-3)
    assert jnp.allclose(loss2, loss2_r, rtol=5e-3, atol=5e-2)

    # 3) Same shapes with bf16 MXU operands (f32 accumulation / elementwise).
    fea3, loss3 = adaptive_margin_loss(x2, w2, cw2, lab2, mxu_dtype=jnp.bfloat16)
    jax.block_until_ready((fea3, loss3))
    assert jnp.allclose(fea3, fea2_r, rtol=2e-2, atol=2e-2)
    assert jnp.allclose(loss3, loss2_r, rtol=2e-2, atol=2e-1)

    print("KERNEL_OK")
</pallas_src>

<mosaic_0001>
module attributes {stable_mosaic.version = 11 : i64} {
  func.func @_aml_kernel(%arg0: i32, %arg1: memref<8x1xi32, #tpu.memory_space<vmem>>, %arg2: memref<8x32xf32, #tpu.memory_space<vmem>>, %arg3: memref<8x32xf32, #tpu.memory_space<vmem>>, %arg4: memref<16x32xf32, #tpu.memory_space<vmem>>, %arg5: memref<1x16xf32, #tpu.memory_space<vmem>>, %arg6: memref<8x16xf32, #tpu.memory_space<vmem>>, %arg7: memref<1x1xf32, #tpu.memory_space<smem>>, %arg8: memref<8x32xf32, #tpu.memory_space<vmem>>, %arg9: memref<8x32xf32, #tpu.memory_space<vmem>>, %arg10: memref<8x1xf32, #tpu.memory_space<vmem>>, %arg11: memref<8x1xf32, #tpu.memory_space<vmem>>, %arg12: memref<8x1xf32, #tpu.memory_space<vmem>>, %arg13: memref<8x1xf32, #tpu.memory_space<vmem>>) attributes {dimension_semantics = [#tpu.dimension_semantics<arbitrary>], iteration_bounds = array<i64: 1>, scalar_prefetch = 0 : i64, scratch_operands = 6 : i64, tpu.core_type = #tpu.core_type<tc>, window_params = [{pipeline_mode = #tpu.pipeline_mode<synchronous>, transform_indices = @transform_0, window_bounds = array<i64: 8, 1>}, {pipeline_mode = #tpu.pipeline_mode<synchronous>, transform_indices = @transform_1, window_bounds = array<i64: 8, 32>}, {pipeline_mode = #tpu.pipeline_mode<synchronous>, transform_indices = @transform_2, window_bounds = array<i64: 8, 32>}, {transform_indices = @transform_3, window_bounds = array<i64: 16, 32>}, {transform_indices = @transform_4, window_bounds = array<i64: 1, 16>}, {transform_indices = @transform_5, window_bounds = array<i64: 8, 16>}, {transform_indices = @transform_6, window_bounds = array<i64: 1, 1>}]} {
    %c0 = arith.constant 0 : index
    %c0_0 = arith.constant 0 : index
    %0 = vector.load %arg4[%c0, %c0_0] : memref<16x32xf32, #tpu.memory_space<vmem>>, vector<16x32xf32>
    %1 = arith.mulf %0, %0 : vector<16x32xf32>
    %cst = arith.constant dense<0.000000e+00> : vector<16xf32>
    %2 = vector.multi_reduction <add>, %1, %cst [1] : vector<16x32xf32> to vector<16xf32>
    %3 = vector.shape_cast %2 : vector<16xf32> to vector<16x1xf32>
    %cst_1 = arith.constant 1.000000e-24 : f32
    %4 = vector.broadcast %cst_1 : f32 to vector<16x1xf32>
    %5 = arith.maximumf %3, %4 : vector<16x1xf32>
    %6 = math.rsqrt %5 : vector<16x1xf32>
    %7 = vector.broadcast %6 : vector<16x1xf32> to vector<16x32xf32>
    %8 = arith.mulf %0, %7 : vector<16x32xf32>
    %c0_i32 = arith.constant 0 : i32
    %9 = arith.cmpi eq, %arg0, %c0_i32 : i32
    %10 = arith.extui %9 : i1 to i32
    %cst_2 = arith.constant 1.000000e-24 : f32
    %c0_i32_3 = arith.constant 0 : i32
    %11 = arith.cmpi ne, %10, %c0_i32_3 : i32
    scf.if %11 {
      %c0_38 = arith.constant 0 : index
      %c0_39 = arith.constant 0 : index
      %61 = vector.load %arg2[%c0_38, %c0_39] : memref<8x32xf32, #tpu.memory_space<vmem>>, vector<8x32xf32>
      %62 = arith.mulf %61, %61 : vector<8x32xf32>
      %cst_40 = arith.constant dense<0.000000e+00> : vector<8xf32>
      %63 = vector.multi_reduction <add>, %62, %cst_40 [1] : vector<8x32xf32> to vector<8xf32>
      %64 = vector.shape_cast %63 : vector<8xf32> to vector<8x1xf32>
      %65 = vector.broadcast %cst_2 : f32 to vector<8x1xf32>
      %66 = arith.maximumf %64, %65 : vector<8x1xf32>
      %67 = math.rsqrt %66 : vector<8x1xf32>
      %68 = vector.broadcast %67 : vector<8x1xf32> to vector<8x32xf32>
      %69 = arith.mulf %61, %68 : vector<8x32xf32>
      %c0_41 = arith.constant 0 : index
      %c0_42 = arith.constant 0 : index
      %70 = vector.load %arg3[%c0_41, %c0_42] : memref<8x32xf32, #tpu.memory_space<vmem>>, vector<8x32xf32>
      %71 = arith.mulf %70, %70 : vector<8x32xf32>
      %cst_43 = arith.constant dense<0.000000e+00> : vector<8xf32>
      %72 = vector.multi_reduction <add>, %71, %cst_43 [1] : vector<8x32xf32> to vector<8xf32>
      %73 = vector.shape_cast %72 : vector<8xf32> to vector<8x1xf32>
      %74 = vector.broadcast %cst_2 : f32 to vector<8x1xf32>
      %75 = arith.maximumf %73, %74 : vector<8x1xf32>
      %76 = math.rsqrt %75 : vector<8x1xf32>
      %77 = vector.broadcast %76 : vector<8x1xf32> to vector<8x32xf32>
      %78 = arith.mulf %70, %77 : vector<8x32xf32>
      %c0_44 = arith.constant 0 : index
      %c0_45 = arith.constant 0 : index
      %79 = vector.load %arg8[%c0_44, %c0_45] : memref<8x32xf32, #tpu.memory_space<vmem>>, vector<8x32xf32>
      tpu.vector_store %arg8[%c0_44, %c0_45], %69 {strides = array<i32>} : memref<8x32xf32, #tpu.memory_space<vmem>>, vector<8x32xf32>,
      %c0_46 = arith.constant 0 : index
      %c0_47 = arith.constant 0 : index
      %80 = vector.load %arg9[%c0_46, %c0_47] : memref<8x32xf32, #tpu.memory_space<vmem>>, vector<8x32xf32>
      tpu.vector_store %arg9[%c0_46, %c0_47], %78 {strides = array<i32>} : memref<8x32xf32, #tpu.memory_space<vmem>>, vector<8x32xf32>,
      %81 = arith.mulf %69, %78 : vector<8x32xf32>
      %cst_48 = arith.constant dense<0.000000e+00> : vector<8xf32>
      %82 = vector.multi_reduction <add>, %81, %cst_48 [1] : vector<8x32xf32> to vector<8xf32>
      %83 = vector.shape_cast %82 : vector<8xf32> to vector<8x1xf32>
      %c0_49 = arith.constant 0 : index
      %c0_50 = arith.constant 0 : index
      %84 = vector.load %arg10[%c0_49, %c0_50] : memref<8x1xf32, #tpu.memory_space<vmem>>, vector<8x1xf32>
      tpu.vector_store %arg10[%c0_49, %c0_50], %83 {strides = array<i32>} : memref<8x1xf32, #tpu.memory_space<vmem>>, vector<8x1xf32>,
      %cst_51 = arith.constant 0xFF800000 : f32
      %85 = vector.broadcast %cst_51 : f32 to vector<8x1xf32>
      %c0_52 = arith.constant 0 : index
      %c0_53 = arith.constant 0 : index
      %86 = vector.load %arg11[%c0_52, %c0_53] : memref<8x1xf32, #tpu.memory_space<vmem>>, vector<8x1xf32>
      tpu.vector_store %arg11[%c0_52, %c0_53], %85 {strides = array<i32>} : memref<8x1xf32, #tpu.memory_space<vmem>>, vector<8x1xf32>,
      %cst_54 = arith.constant 0.000000e+00 : f32
      %87 = vector.broadcast %cst_54 : f32 to vector<8x1xf32>
      %c0_55 = arith.constant 0 : index
      %c0_56 = arith.constant 0 : index
      %88 = vector.load %arg12[%c0_55, %c0_56] : memref<8x1xf32, #tpu.memory_space<vmem>>, vector<8x1xf32>
      tpu.vector_store %arg12[%c0_55, %c0_56], %87 {strides = array<i32>} : memref<8x1xf32, #tpu.memory_space<vmem>>, vector<8x1xf32>,
      %cst_57 = arith.constant 0xFF800000 : f32
      %89 = vector.broadcast %cst_57 : f32 to vector<8x1xf32>
      %c0_58 = arith.constant 0 : index
      %c0_59 = arith.constant 0 : index
      %90 = vector.load %arg13[%c0_58, %c0_59] : memref<8x1xf32, #tpu.memory_space<vmem>>, vector<8x1xf32>
      tpu.vector_store %arg13[%c0_58, %c0_59], %89 {strides = array<i32>} : memref<8x1xf32, #tpu.memory_space<vmem>>, vector<8x1xf32>,
    } else {
    }
    %c0_4 = arith.constant 0 : index
    %c0_5 = arith.constant 0 : index
    %12 = vector.load %arg8[%c0_4, %c0_5] : memref<8x32xf32, #tpu.memory_space<vmem>>, vector<8x32xf32>
    %c0_6 = arith.constant 0 : index
    %c0_7 = arith.constant 0 : index
    %13 = vector.load %arg9[%c0_6, %c0_7] : memref<8x32xf32, #tpu.memory_space<vmem>>, vector<8x32xf32>
    %cst_8 = arith.constant dense<0.000000e+00> : vector<8x16xf32>
    %14 = tpu.matmul %12, %8, %cst_8 {dimension_numbers = #tpu.dot_dimension_numbers<[1], [1], [0], [0], [0, 0, 1, 0], [], []>} : vector<8x32xf32>, vector<16x32xf32>, vector<8x16xf32> -> vector<8x16xf32>
    %c0_9 = arith.constant 0 : index
    %c0_10 = arith.constant 0 : index
    %15 = vector.load %arg6[%c0_9, %c0_10] : memref<8x16xf32, #tpu.memory_space<vmem>>, vector<8x16xf32>
    tpu.vector_store %arg6[%c0_9, %c0_10], %14 {strides = array<i32>} : memref<8x16xf32, #tpu.memory_space<vmem>>, vector<8x16xf32>,
    %c0_11 = arith.constant 0 : index
    %c0_12 = arith.constant 0 : index
    %16 = vector.load %arg1[%c0_11, %c0_12] : memref<8x1xi32, #tpu.memory_space<vmem>>, vector<8x1xi32>
    %17 = tpu.iota {dimensions = array<i32: 1>} : vector<8x16xi32>
    %c16_i32 = arith.constant 16 : i32
    %18 = arith.muli %arg0, %c16_i32 : i32
    %19 = vector.broadcast %18 : i32 to vector<8x16xi32>
    %20 = arith.addi %17, %19 : vector<8x16xi32>
    %21 = vector.broadcast %16 : vector<8x1xi32> to vector<8x16xi32>
    %22 = arith.cmpi eq, %20, %21 : vector<8x16xi32>
    %cst_13 = arith.constant 9.600000e+00 : f32
    %23 = vector.broadcast %cst_13 : f32 to vector<8x16xf32>
    %24 = arith.mulf %23, %14 : vector<8x16xf32>
    %c0_14 = arith.constant 0 : index
    %c0_15 = arith.constant 0 : index
    %25 = vector.load %arg5[%c0_14, %c0_15] : memref<1x16xf32, #tpu.memory_space<vmem>>, vector<1x16xf32>
    %26 = vector.broadcast %25 : vector<1x16xf32> to vector<8x16xf32>
    %27 = arith.addf %24, %26 : vector<8x16xf32>
    %cst_16 = arith.constant -1.000000e+30 : f32
    %28 = vector.broadcast %cst_16 : f32 to vector<8x16xf32>
    %29 = arith.select %22, %28, %27 : vector<8x16xi1>, vector<8x16xf32>
    %c0_17 = arith.constant 0 : index
    %c0_18 = arith.constant 0 : index
    %30 = vector.load %arg11[%c0_17, %c0_18] : memref<8x1xf32, #tpu.memory_space<vmem>>, vector<8x1xf32>
    %cst_19 = arith.constant dense<0xFF800000> : vector<8xf32>
    %31 = vector.multi_reduction <maximumf>, %29, %cst_19 [1] : vector<8x16xf32> to vector<8xf32>
    %32 = vector.shape_cast %31 : vector<8xf32> to vector<8x1xf32>
    %33 = arith.maximumf %30, %32 : vector<8x1xf32>
    %c0_20 = arith.constant 0 : index
    %c0_21 = arith.constant 0 : index
    %34 = vector.load %arg12[%c0_20, %c0_21] : memref<8x1xf32, #tpu.memory_space<vmem>>, vector<8x1xf32>
    %35 = arith.subf %30, %33 : vector<8x1xf32>
    %36 = math.exp %35 : vector<8x1xf32>
    %37 = arith.mulf %34, %36 : vector<8x1xf32>
    %38 = vector.broadcast %33 : vector<8x1xf32> to vector<8x16xf32>
    %39 = arith.subf %29, %38 : vector<8x16xf32>
    %40 = math.exp %39 : vector<8x16xf32>
    %cst_22 = arith.constant dense<0.000000e+00> : vector<8xf32>
    %41 = vector.multi_reduction <add>, %40, %cst_22 [1] : vector<8x16xf32> to vector<8xf32>
    %42 = vector.shape_cast %41 : vector<8xf32> to vector<8x1xf32>
    %43 = arith.addf %37, %42 : vector<8x1xf32>
    %c0_23 = arith.constant 0 : index
    %c0_24 = arith.constant 0 : index
    %44 = vector.load %arg12[%c0_23, %c0_24] : memref<8x1xf32, #tpu.memory_space<vmem>>, vector<8x1xf32>
    tpu.vector_store %arg12[%c0_23, %c0_24], %43 {strides = array<i32>} : memref<8x1xf32, #tpu.memory_space<vmem>>, vector<8x1xf32>,
    %c0_25 = arith.constant 0 : index
    %c0_26 = arith.constant 0 : index
    %45 = vector.load %arg11[%c0_25, %c0_26] : memref<8x1xf32, #tpu.memory_space<vmem>>, vector<8x1xf32>
    tpu.vector_store %arg11[%c0_25, %c0_26], %33 {strides = array<i32>} : memref<8x1xf32, #tpu.memory_space<vmem>>, vector<8x1xf32>,
    %cst_27 = arith.constant dense<0.000000e+00> : vector<8x16xf32>
    %46 = tpu.matmul %13, %8, %cst_27 {dimension_numbers = #tpu.dot_dimension_numbers<[1], [1], [0], [0], [0, 0, 1, 0], [], []>} : vector<8x32xf32>, vector<16x32xf32>, vector<8x16xf32> -> vector<8x16xf32>
    %cst_28 = arith.constant -1.000000e+00 : f32
    %cst_29 = arith.constant 1.000000e+00 : f32
    %47 = vector.broadcast %cst_28 : f32 to vector<8x16xf32>
    %48 = arith.maximumf %47, %46 : vector<8x16xf32>
    %49 = vector.broadcast %cst_29 : f32 to vector<8x16xf32>
    %50 = arith.minimumf %49, %48 : vector<8x16xf32>
    %cst_30 = arith.constant 0.000000e+00 : f32
    %51 = vector.broadcast %cst_30 : f32 to vector<8x16xf32>
    %52 = arith.select %22, %51, %50 : vector<8x16xi1>, vector<8x16xf32>
    %c0_31 = arith.constant 0 : index
    %c0_32 = arith.constant 0 : index
    %53 = vector.load %arg13[%c0_31, %c0_32] : memref<8x1xf32, #tpu.memory_space<vmem>>, vector<8x1xf32>
    %cst_33 = arith.constant dense<0xFF800000> : vector<8xf32>
    %54 = vector.multi_reduction <maximumf>, %52, %cst_33 [1] : vector<8x16xf32> to vector<8xf32>
    %55 = vector.shape_cast %54 : vector<8xf32> to vector<8x1xf32>
    %56 = arith.maximumf %53, %55 : vector<8x1xf32>
    %c0_34 = arith.constant 0 : index
    %c0_35 = arith.constant 0 : index
    %57 = vector.load %arg13[%c0_34, %c0_35] : memref<8x1xf32, #tpu.memory_space<vmem>>, vector<8x1xf32>
    tpu.vector_store %arg13[%c0_34, %c0_35], %56 {strides = array<i32>} : memref<8x1xf32, #tpu.memory_space<vmem>>, vector<8x1xf32>,
    %c0_i32_36 = arith.constant 0 : i32
    %58 = arith.cmpi eq, %arg0, %c0_i32_36 : i32
    %59 = arith.extui %58 : i1 to i32
    %c0_i32_37 = arith.constant 0 : i32
    %60 = arith.cmpi ne, %59, %c0_i32_37 : i32
    scf.if %60 {
      %c0_38 = arith.constant 0 : index
      %c0_39 = arith.constant 0 : index
      %61 = vector.load %arg11[%c0_38, %c0_39] : memref<8x1xf32, #tpu.memory_space<vmem>>, vector<8x1xf32>
      %c0_40 = arith.constant 0 : index
      %c0_41 = arith.constant 0 : index
      %62 = vector.load %arg12[%c0_40, %c0_41] : memref<8x1xf32, #tpu.memory_space<vmem>>, vector<8x1xf32>
      %63 = math.log %62 : vector<8x1xf32>
      %64 = arith.addf %61, %63 : vector<8x1xf32>
      %c0_42 = arith.constant 0 : index
      %c0_43 = arith.constant 0 : index
      %65 = vector.load %arg10[%c0_42, %c0_43] : memref<8x1xf32, #tpu.memory_space<vmem>>, vector<8x1xf32>
      %cst_44 = arith.constant 9.600000e+00 : f32
      %66 = vector.broadcast %cst_44 : f32 to vector<8x1xf32>
      %67 = arith.mulf %66, %65 : vector<8x1xf32>
      %68 = arith.subf %64, %67 : vector<8x1xf32>
      %cst_45 = arith.constant 0.000000e+00 : f32
      %69 = vector.broadcast %cst_45 : f32 to vector<8x1xf32>
      %70 = arith.maximumf %68, %69 : vector<8x1xf32>
      %71 = math.absf %68 : vector<8x1xf32>
      %cst_46 = arith.constant 0.000000e+00 : f32
      %72 = vector.broadcast %cst_46 : f32 to vector<8x1xf32>
      %73 = arith.subf %72, %71 : vector<8x1xf32>
      %74 = math.exp %73 : vector<8x1xf32>
      %75 = math.log1p %74 : vector<8x1xf32>
      %76 = arith.addf %70, %75 : vector<8x1xf32>
      %c0_47 = arith.constant 0 : index
      %c0_48 = arith.constant 0 : index
      %77 = vector.load %arg13[%c0_47, %c0_48] : memref<8x1xf32, #tpu.memory_space<vmem>>, vector<8x1xf32>
      %78 = vector.shape_cast %77 : vector<8x1xf32> to vector<1x8x1xf32>
      %cst_49 = arith.constant dense<0.000000e+00> : vector<1xf32>
      %79 = vector.multi_reduction <add>, %78, %cst_49 [1, 2] : vector<1x8x1xf32> to vector<1xf32>
      %80 = vector.shape_cast %79 : vector<1xf32> to vector<1x1x1xf32>
      %81 = vector.extract %80[0, 0, 0] : f32 from vector<1x1x1xf32>
      %cst_50 = arith.constant 8.000000e+00 : f32
      %82 = arith.divf %81, %cst_50 : f32
      %cst_51 = arith.constant 5.000000e-01 : f32
      %83 = arith.addf %82, %cst_51 : f32
      %cst_52 = arith.constant 0.000000e+00 : f32
      %84 = arith.maximumf %83, %cst_52 : f32
      %85 = math.absf %83 : f32
      %cst_53 = arith.constant 0.000000e+00 : f32
      %86 = arith.subf %cst_53, %85 : f32
      %87 = math.exp %86 : f32
      %88 = math.log1p %87 : f32
      %89 = arith.addf %84, %88 : f32
      %90 = vector.shape_cast %76 : vector<8x1xf32> to vector<1x8x1xf32>
      %cst_54 = arith.constant dense<0.000000e+00> : vector<1xf32>
      %91 = vector.multi_reduction <add>, %90, %cst_54 [1, 2] : vector<1x8x1xf32> to vector<1xf32>
      %92 = vector.shape_cast %91 : vector<1xf32> to vector<1x1x1xf32>
      %93 = vector.extract %92[0, 0, 0] : f32 from vector<1x1x1xf32>
      %cst_55 = arith.constant 8.000000e+00 : f32
      %94 = arith.divf %93, %cst_55 : f32
      %cst_56 = arith.constant 1.000000e+01 : f32
      %95 = arith.mulf %cst_56, %89 : f32
      %96 = arith.addf %94, %95 : f32
      %c0_57 = arith.constant 0 : index
      %c0_58 = arith.constant 0 : index
      %97 = memref.load %arg7[%c0_57, %c0_58] : memref<1x1xf32, #tpu.memory_space<smem>>
      memref.store %96, %arg7[%c0_57, %c0_58] : memref<1x1xf32, #tpu.memory_space<smem>>
    } else {
    }
    return
  }
  func.func @transform_0(%arg0: i32) -> (i32, i32) {
    %c0_i32 = arith.constant 0 : i32
    %c0_i32_0 = arith.constant 0 : i32
    %c0_i32_1 = arith.constant 0 : i32
    return %c0_i32, %c0_i32_0 : i32, i32
  }
  func.func @transform_1(%arg0: i32) -> (i32, i32) {
    %c0_i32 = arith.constant 0 : i32
    %c0_i32_0 = arith.constant 0 : i32
    %c0_i32_1 = arith.constant 0 : i32
    return %c0_i32, %c0_i32_0 : i32, i32
  }
  func.func @transform_2(%arg0: i32) -> (i32, i32) {
    %c0_i32 = arith.constant 0 : i32
    %c0_i32_0 = arith.constant 0 : i32
    %c0_i32_1 = arith.constant 0 : i32
    return %c0_i32, %c0_i32_0 : i32, i32
  }
  func.func @transform_3(%arg0: i32) -> (i32, i32) {
    %c0_i32 = arith.constant 0 : i32
    %c0_i32_0 = arith.constant 0 : i32
    return %arg0, %c0_i32 : i32, i32
  }
  func.func @transform_4(%arg0: i32) -> (i32, i32) {
    %c0_i32 = arith.constant 0 : i32
    %c0_i32_0 = arith.constant 0 : i32
    return %c0_i32, %arg0 : i32, i32
  }
  func.func @transform_5(%arg0: i32) -> (i32, i32) {
    %c0_i32 = arith.constant 0 : i32
    %c0_i32_0 = arith.constant 0 : i32
    return %c0_i32, %arg0 : i32, i32
  }
  func.func @transform_6(%arg0: i32) -> (i32, i32) {
    %c0_i32 = arith.constant 0 : i32
    %c0_i32_0 = arith.constant 0 : i32
    %c0_i32_1 = arith.constant 0 : i32
    return %c0_i32, %c0_i32_0 : i32, i32
  }
}

</mosaic_0001>

<bundles_post_ra>
// kernel: tpu_custom_call.1
= control target key start
LH: loop header
LB: loop body
LE: loop exit
PB: predicated region body
PF: predicated region fallthrough
CT: control target
= control target key end

     0   :  { %12 = vsyncpa [#allocation9], 0  ;;  %s658_s0 = inlined_call_operand.vmem [shape: s32[8,1], index: 0, kind: input, shape index: {}]   ;;  %s659_s1 = inlined_call_operand.vmem [shape: f32[8,32], index: 1, kind: input, shape index: {}]   ;;  %s660_s2 = inlined_call_operand.hbm [shape: f32[8,32], index: 2, kind: input, shape index: {}]   ;;  %s661_s3 = inlined_call_operand.hbm [shape: f32[16,32], index: 3, kind: input, shape index: {}]   ;;  %s662_s4 = inlined_call_operand.vmem [shape: f32[1,16], index: 4, kind: input, shape index: {}]   ;;  %s663_s5 = inlined_call_operand.hbm [shape: f32[8,16], index: 5, kind: output, shape index: {0}]   ;;  %s664_s6 = inlined_call_operand.hbm [shape: f32[1,1], index: 6, kind: output, shape index: {1}]  }
   0x1   :  { %13 = vsyncpa [#allocation13], 0 }
   0x2   :  { %14 = vsyncpa [#allocation10], 0 }
   0x3   :  { %15 = vsyncpa [#allocation11], 0  ;;  %s561_s21 = smov [#allocation8]   ;;  %s562_s23 = smov [#allocation12]  }
   0x4   :  { %s26_s22 = sshll.u32 %s561_s21, 4  ;;  %s35_s24 = sshll.u32 %s562_s23, 4  ;;  %s27_s22 = int_to_ptr.vmem [resolvable:$true] %s26_s22  ;;  %s36_s24 = int_to_ptr.vmem [resolvable:$true] %s35_s24 }
   0x5   :  { %s493_s25 = scalar_lea.vmem %s27_s22, 128  ;;  %p498_p1 = scmp.lt.s32.totalorder %s27_s22, %s27_s22 }
   0x6   :  { %p494_p0 = scmp.ne.s32.totalorder %s27_s22, %s493_s25  ;;  %p499_p2 = scmp.lt.s32.totalorder %s493_s25, %s493_s25 }
   0x8   :  { %p500_p3 = por %p499_p2, %p498_p1 }
   0xa   :  { %p501_p4 = pnand %p500_p3, %p494_p0 }
   0xc   :  { %504 = shalt.err (!%p501_p4)
}
   0xd   :  { %29 = dma.hbm_to_vmem [thread:$0]  %s660_s2, 128, %s27_s22, [#allocation9]  }
   0xe   :  { %s513_s28 = scalar_lea.vmem %s36_s24, 256  ;;  %p518_p6 = scmp.lt.s32.totalorder %s36_s24, %s36_s24 }
   0xf   :  { %p514_p5 = scmp.ne.s32.totalorder %s36_s24, %s513_s28  ;;  %p519_p7 = scmp.lt.s32.totalorder %s513_s28, %s513_s28 }
  0x11   :  { %p520_p8 = por %p519_p7, %p518_p6 }
  0x13   :  { %p521_p9 = pnand %p520_p8, %p514_p5 }
  0x15   :  { %524 = shalt.err (!%p521_p9)
}
  0x16   :  { %s563_s29 = smov 128   ;;  %s564_s30 = smov 8  }
  0x17   :  { %41 = dma.hbm_to_vmem [thread:$0]  %s661_s3, 256, %s36_s24, [#allocation13], %s563_s29, %s563_s29, %s564_s30  }
  0x18   :  { %553 = dma.done.wait [#allocation9], 128  }
  0x19   :  { %554 = vsyncadd [#allocation9], 4294967168 }
  0x1a   :  { %555 = dma.done.wait [#allocation13], 256  }
  0x1b   :  { %556 = vsyncadd [#allocation13], 4294967040  ;;  %vm54_vm0 = vcmask 261120   ;;  %v71_v0 = vld [vmem:[%s659_s1] sm:$0xff]  ;;  %v50_v1 = vld [vmem:[#allocation12] sm:$0xff]  ;;  %v565_v12 = vmov 0.0   ;;  %v182_v35 = vlaneseq }
  0x1c   :  { %v51_v2 = vld [vmem:[#allocation12 + $0x8] sm:$0xff]  ;;  %v72_v3 = vmul.f32 %v71_v0, %v71_v0  ;;  %v52_v4 = vmul.f32 %v50_v1, %v50_v1  ;;  %v79_v6 = vld [vmem:[#allocation8] sm:$0xff]  ;;  %428 = vmatprep.subr.mxu0 %v565_v12  ;;  %435 = vmatprep.subr.mxu1 %v565_v12  ;;  %vm566_vm1 = vmmov 0   ;;  %v567_v14 = vmov 0   ;;  %s569_s16 = smov [#allocation14]  }
  0x1d   :  { %v53_v5 = vmul.f32 %v51_v2, %v51_v2  ;;  %v80_v7 = vmul.f32 %v79_v6, %v79_v6  ;;  %432 = vmatprep.mubr.msk.f32.mxu0 %vm566_vm1, %v565_v12  ;;  %439 = vmatprep.mubr.msk.f32.mxu1 %vm566_vm1, %v565_v12  ;;  %v181_v13 = vld [vmem:[%s658_s0] sm:$0xff]  ;;  %vm93_vm2 = vcmask 7168   ;;  %v568_v34 = vmov -inf   ;;  %s391_s17 = sshll.u32 %s569_s16, 4  ;;  %s392_s17 = int_to_ptr.vmem [resolvable:$true] %s391_s17 }
  0x1e   :  { %v73_v8 = vsel %vm54_vm0, %v72_v3, 0.0  ;;  %v55_v9 = vsel %vm54_vm0, %v52_v4, 0.0  ;;  %461 = vset.pattern.permute.xlu0 %v567_v14  ;;  %462 = vset.pattern.permute.xlu1 %v567_v14  ;;  %95 = vst.msk [vmem:[#allocation5] sm:$0xff] %vm93_vm2, %v568_v34  ;;  %96 = vst.msk [vmem:[#allocation6] sm:$0xff] %vm93_vm2, %v565_v12  ;;  %v183_v36 = vand.u32 127, %v182_v35  ;;  %vm179_vm3 = vcmask 130048   ;;  %p530_p11 = scmp.lt.s32.totalorder %s392_s17, %s392_s17 }
  0x1f   :  { %74 = vadd.xlane.f32.xlu0 %v73_v8  ;;  %56 = vadd.xlane.f32.xlu1 %v55_v9  ;;  %v58_v10 = vsel %vm54_vm0, %v53_v5, 0.0  ;;  %v81_v11 = vsel %vm54_vm0, %v80_v7, 0.0  ;;  %97 = vst.msk [vmem:[#allocation7] sm:$0xff] %vm93_vm2, %v568_v34  ;;  %v417_v39 = vld [vmem:[%s662_s4] ss:$0 sm:$0xff]  ;;  %s525_s18 = scalar_lea.vmem %s392_s17, 128 }
  0x20   :  { %p526_p10 = scmp.ne.s32.totalorder %s392_s17, %s525_s18  ;;  %p531_p12 = scmp.lt.s32.totalorder %s525_s18, %s525_s18 }
  0x22   :  { %p532_p13 = por %p531_p12, %p530_p11 }
  0x23   :  { %59 = vadd.xlane.f32.xlu0 %v58_v10  ;;  %82 = vadd.xlane.f32.xlu1 %v81_v11 }
  0x24   :  { %p533_p0 = pnand %p532_p13, %p526_p10 }
  0x25   :  { %v201_v50 = vld [vmem:[#allocation5] sm:$0xff]  ;;  %v206_v14 = vld [vmem:[#allocation6] sm:$0xff] }
  0x26   :  { %v302_v53 = vld [vmem:[#allocation7] sm:$0xff] }
  0x39   :  { %188 = vperm.xlu0 %461, %v181_v13  }
  0xa8   :  { %v75_v15 = vpop.xlane.xlu0 %74  ;;  %v57_v16 = vpop.xlane.xlu1 %56 }
  0xa9   :  { %v76_v17 = vmax.f32 %v75_v15, 1e-24  ;;  %v61_v18 = vmax.f32 %v57_v16, 1e-24 }
  0xab   :  { %463 = vrsqrt.f32 %v76_v17 }
  0xac   :  { %v60_v19 = vpop.xlane.xlu0 %59  ;;  %v83_v20 = vpop.xlane.xlu1 %82  ;;  %465 = vrsqrt.f32 %v61_v18 }
  0xad   :  { %v62_v21 = vmax.f32 %v60_v19, 1e-24  ;;  %v84_v22 = vmax.f32 %v83_v20, 1e-24 }
  0xaf   :  { %467 = vrsqrt.f32 %v62_v21 }
  0xb0   :  { %469 = vrsqrt.f32 %v84_v22 }
  0xb4   :  { %v189_v37 = vpop.permute.xlu0 %188 }
  0xb5   :  { %vm190_vm4 = vcmp.eq.s32.totalorder %v183_v36, %v189_v37 }
  0xb8   :  { %v464_v23 = vpop.eup %463 }
  0xb9   :  { %v78_v24 = vmul.f32 %v464_v23, %v71_v0  ;;  %v466_v25 = vpop.eup %465 }
  0xba   :  { %v65_v30 = vmul.f32 %v466_v25, %v50_v1 }
  0xbb   :  { %87 = vst.msk [vmem:[#allocation2] sm:$0xff] %vm54_vm0, %v78_v24 }
  0xbc   :  { %v468_v26 = vpop.eup %467 }
  0xbd   :  { %v470_v27 = vpop.eup %469  ;;  %v66_v28 = vmul.f32 %v468_v26, %v51_v2 }
  0xbe   :  { %v86_v29 = vmul.f32 %v470_v27, %v79_v6 }
  0xbf   :  { %429 = vmatpush3.xpose.msk.msra.mxu0 %vm54_vm0, %v66_v28  ;;  %436 = vmatpush3.xpose.msk.msra.mxu1 %vm54_vm0, %v66_v28 }
  0xc0   :  { %88 = vst.msk [vmem:[#allocation3] sm:$0xff] %vm54_vm0, %v86_v29  ;;  %430 = vmatprep.subr.mxu0 %v565_v12  ;;  %437 = vmatprep.subr.mxu1 %v565_v12  ;;  %v89_v31 = vmul.f32 %v86_v29, %v78_v24 }
  0xc2   :  { %v98_v32 = vld [vmem:[#allocation2] sm:$0xff]  ;;  %v90_v59 = vsel %vm54_vm0, %v89_v31, 0.0 }
  0xc3   :  { %431 = vmatpush3.xpose.msk.msra.mxu0 %vm54_vm0, %v65_v30  ;;  %438 = vmatpush3.xpose.msk.msra.mxu1 %vm54_vm0, %v65_v30 }
  0xc6   :  { %433 = vmatmul.mubr.msk.f32.vlgmr.msra.gmra.mxu0 %vm54_vm0, %v98_v32 }
  0xc7   :  { %v99_v33 = vld [vmem:[#allocation3] sm:$0xff] }
  0xc8   :  { %440 = vmatmul.mubr.msk.f32.vlgmr.msra.gmra.mxu1 %vm54_vm0, %v99_v33 }
 0x186   :  { %v175_v38 = vpop.f32.mrf.mxu0 }
 0x187   :  { %v191_v40 = vmul.f32 9.6, %v175_v38  ;;  %180 = vst.msk [vmem:[#allocation14] sm:$0xff] %vm179_vm3, %v175_v38 }
 0x188   :  { %v434_v41 = vpop.f32.mrf.mxu0  ;;  %v295_v42 = vpop.f32.mrf.mxu1 }
 0x189   :  { %v421_v43 = vclamps-f32 %v295_v42, 1.0  ;;  %v199_v44 = vadd.f32 %v417_v39, %v191_v40 }
 0x18a   :  { %v441_v45 = vpop.f32.mrf.mxu1 }
 0x18b   :  { %v200_v46 = vsel %vm190_vm4, -1e+30, %v199_v44  ;;  %v301_v48 = vsel %vm190_vm4, 0.0, %v421_v43 }
 0x18c   :  { %v202_v47 = vsel %vm179_vm3, %v200_v46, -inf  ;;  %v303_v49 = vsel %vm179_vm3, %v301_v48, -inf }
 0x18d   :  { %203 = vmax.xlane.f32.xlu1 %v202_v47 }
 0x191   :  { %304 = vmax.xlane.f32.xlu1 %v303_v49 }
 0x216   :  { %v204_v51 = vpop.xlane.xlu1 %203 }
 0x217   :  { %v205_v52 = vmax.f32 %v201_v50, %v204_v51 }
 0x219   :  { %v207_v54 = vsub.f32 %v201_v50, %v205_v52  ;;  %225 = vst.msk [vmem:[#allocation5] sm:$0xff] %vm93_vm2, %v205_v52  ;;  %213 = vperm.xlu1 %462, %v205_v52  }
 0x21a   :  { %v305_v55 = vpop.xlane.xlu1 %304 }
 0x21b   :  { %v306_v56 = vmax.f32 %v302_v53, %v305_v55  ;;  %v208_v12 = vmul.f32 1.442695, %v207_v54 }
 0x21d   :  { %307 = vst.msk [vmem:[#allocation7] sm:$0xff] %vm93_vm2, %v306_v56 }
 0x220   :  { %v311_v22 = vld [vmem:[#allocation5] sm:$0xff] }
 0x224   :  { %v334_v57 = vld [vmem:[#allocation7] sm:$0xff] }
 0x225   :  { %v335_v58 = vsel %vm93_vm2, %v334_v57, 0.0 }
 0x23d   :  { %336 = vadd.xlane.f32.xlu1 %v335_v58 }
 0x241   :  { %91 = vadd.xlane.f32.xlu1 %v90_v59 }
 0x294   :  { %v214_v60 = vpop.permute.xlu1 %213 }
 0x295   :  { %v216_v61 = vsub.f32 %v200_v46, %v214_v60 }
 0x297   :  { %v217_v62 = vmul.f32 1.442695, %v216_v61 }
 0x299   :  { %471 = vpow2.f32 %v217_v62 }
 0x2a6   :  { %v472_v63 = vpop.eup %471 }
 0x2a7   :  { %v219_v0 = vsel %vm179_vm3, %v472_v63, 0.0 }
 0x2a8   :  { %220 = vadd.xlane.f32.xlu0 %v219_v0 }
 0x2c6   :  { %v337_v1 = vpop.xlane.xlu1 %336 }
 0x2c7   :  { %v338_v2 = vrot.slane %v337_v1, 4 }
 0x2c9   :  { %v339_v3 = vadd.f32 %v338_v2, %v337_v1 }
 0x2ca   :  { %v92_v4 = vpop.xlane.xlu1 %91 }
 0x2cb   :  { %v340_v5 = vrot.slane %v339_v3, 2  ;;  %94 = vst.msk [vmem:[#allocation4] sm:$0xff] %vm93_vm2, %v92_v4 }
 0x2cd   :  { %v341_v6 = vadd.f32 %v340_v5, %v339_v3 }
 0x2cf   :  { %v342_v7 = vrot.slane %v341_v6, 1 }
 0x2d1   :  { %v343_v8 = vadd.f32 %v342_v7, %v341_v6 }
 0x2d2   :  { %v316_v20 = vld [vmem:[#allocation4] sm:$0xff] }
 0x2d3   :  { %442 = vpush %v343_v8  ;;  %v317_v24 = vmul.f32 9.6, %v316_v20 }
 0x304   :  { %s443_s4 = spop %442 }
 0x305   :  { %s347_s11 = smul.f32 0.125, %s443_s4 }
 0x307   :  { %s646_s12 = sadd.f32 0.5, %s347_s11 }
 0x309   :  { %s350_s13 = sand.u32 2147483647, %s646_s12 }
 0x30a   :  { %s351_s14 = ssub.f32 0.0, %s350_s13 }
 0x30c   :  { %v352_v9 = vstv %s351_s14 }
 0x30d   :  { %v353_v10 = vmul.f32 1.442695, %v352_v9 }
 0x30f   :  { %473 = vpow2.f32 %v353_v10 }
 0x310   :  { %475 = vpow2.f32 %v208_v12 }
 0x31c   :  { %v474_v11 = vpop.eup %473 }
 0x31d   :  { %444 = vpush %v474_v11  ;;  %v476_v13 = vpop.eup %475 }
 0x31e   :  { %v210_v15 = vmul.f32 %v476_v13, %v206_v14 }
 0x331   :  { %v221_v16 = vpop.xlane.xlu0 %220 }
 0x332   :  { %v222_v17 = vadd.f32 %v221_v16, %v210_v15 }
 0x334   :  { %224 = vst.msk [vmem:[#allocation6] sm:$0xff] %vm93_vm2, %v222_v17 }
 0x33b   :  { %v312_v18 = vld [vmem:[#allocation6] sm:$0xff] }
 0x33c   :  { %477 = vlog2.f32 %v312_v18 }
 0x349   :  { %v478_v19 = vpop.eup %477 }
 0x34a   :  { %v314_v21 = vmul.f32 0.6931472, %v478_v19 }
 0x34c   :  { %v315_v23 = vadd.f32 %v314_v21, %v311_v22 }
 0x34e   :  { %s445_s15 = spop %444  ;;  %v318_v25 = vsub.f32 %v315_v23, %v317_v24 }
 0x34f   :  { %v356_v26 = vstv %s445_s15 }
 0x350   :  { %v357_v27 = vadd.f32 1.0, %v356_v26  ;;  %v320_v28 = vand.u32 2147483647, %v318_v25  ;;  %v360_v31 = vmul.f32 -0.5, %v356_v26  ;;  %v363_v33 = vand.u32 2147483647, %v356_v26 }
 0x351   :  { %v319_v46 = vmax.f32 %v318_v25, 0.0 }
 0x352   :  { %479 = vlog2.f32 %v357_v27  ;;  %v321_v29 = vsub.f32 0.0, %v320_v28  ;;  %v361_v32 = vadd.f32 1.0, %v360_v31  ;;  %vm364_vm5 = vcmp.lt.f32.partialorder %v363_v33, 0.0004427343 }
 0x354   :  { %v322_v30 = vmul.f32 1.442695, %v321_v29  ;;  %v362_v35 = vmul.f32 %v361_v32, %v356_v26 }
 0x356   :  { %481 = vpow2.f32 %v322_v30 }
 0x35f   :  { %v480_v34 = vpop.eup %479 }
 0x360   :  { %v359_v36 = vmul.f32 0.6931472, %v480_v34 }
 0x362   :  { %v365_v37 = vsel %vm364_vm5, %v362_v35, %v359_v36 }
 0x363   :  { %446 = vpush %v365_v37  ;;  %v482_v38 = vpop.eup %481 }
 0x364   :  { %v324_v39 = vadd.f32 1.0, %v482_v38  ;;  %v327_v40 = vmul.f32 -0.5, %v482_v38  ;;  %v330_v42 = vand.u32 2147483647, %v482_v38 }
 0x366   :  { %483 = vlog2.f32 %v324_v39  ;;  %v328_v41 = vadd.f32 1.0, %v327_v40  ;;  %vm331_vm6 = vcmp.lt.f32.partialorder %v330_v42, 0.0004427343 }
 0x368   :  { %v329_v45 = vmul.f32 %v482_v38, %v328_v41 }
 0x373   :  { %v484_v43 = vpop.eup %483 }
 0x374   :  { %v326_v44 = vmul.f32 0.6931472, %v484_v43 }
 0x376   :  { %v332_v47 = vsel %vm331_vm6, %v329_v45, %v326_v44 }
 0x377   :  { %v333_v48 = vadd.f32 %v332_v47, %v319_v46 }
 0x379   :  { %v368_v49 = vsel %vm93_vm2, %v333_v48, 0.0 }
 0x37a   :  { %369 = vadd.xlane.f32.xlu1 %v368_v49 }
 0x37b   :  { %536 = shalt.err (!%p533_p0)
}
 0x37c   :  { %394 = dma.vmem_to_hbm [thread:$0]  %s392_s17, 128, %s663_s5, [#allocation10]  }
 0x37d   :  { %s570_s22 = smov 0.0   ;;  %s571_s29 = smov [#allocation15]  }
 0x37e   :  { %s349_s23 = smax.f32 %s570_s22, %s646_s12 }
 0x394   :  { %s447_s21 = spop %446 }
 0x395   :  { %s367_s24 = sadd.f32 %s447_s21, %s349_s23 }
 0x397   :  { %s381_s25 = smul.f32 10.0, %s367_s24 }
 0x403   :  { %v370_v50 = vpop.xlane.xlu1 %369 }
 0x404   :  { %v371_v51 = vrot.slane %v370_v50, 4 }
 0x406   :  { %v372_v52 = vadd.f32 %v371_v51, %v370_v50 }
 0x408   :  { %v373_v53 = vrot.slane %v372_v52, 2 }
 0x40a   :  { %v374_v54 = vadd.f32 %v373_v53, %v372_v52 }
 0x40c   :  { %v375_v55 = vrot.slane %v374_v54, 1 }
 0x40e   :  { %v376_v56 = vadd.f32 %v375_v55, %v374_v54 }
 0x410   :  { %448 = vpush %v376_v56 }
 0x441   :  { %s449_s26 = spop %448 }
 0x442   :  { %s380_s27 = smul.f32 0.125, %s449_s26 }
 0x444   :  { %s382_s28 = sadd.f32 %s381_s25, %s380_s27 }
 0x446   :  { %384 = sst [smem:[#allocation15]] %s382_s28 }
 0x447   :  { %402 = dma.smem_to_hbm %s571_s29, 16, %s664_s6, [#allocation11]  }
 0x448   :  { %557 = dma.done.wait [#allocation10], 128  }
 0x449   :  { %558 = vsyncadd [#allocation10], 4294967168 }
 0x44a   :  { %559 = dma.done.wait [#allocation11], 16  }
 0x44b   :  { %560 = vsyncadd [#allocation11], 4294967280 }
 0x44c   :  { %409 = sfence }
 0x44d   :  { %410 = vsyncpa [#allocation9], 1 }
 0x44e   :  { %411 = vsyncpa [#allocation13], 1 }
 0x44f   :  { %412 = vsyncpa [#allocation10], 1 }
 0x450   :  { %413 = vsyncpa [#allocation11], 1 }

</bundles_post_ra>
